<compile_context>
chip_gen: v7x
topology: tpu7x:2x2x1
jax: 0.10.0
libtpu: 0.0.40
codegen_flags: <defaults>
</compile_context>

<pallas_src>
import jax
import jax.numpy as jnp
from jax import lax
from jax.experimental import pallas as pl
from jax.experimental.pallas import tpu as pltpu


def _round_up(v, m):
    return ((v + m - 1) // m) * m


def _highway_kernel(n_layers, d_p):
    def kernel(x_ref, w_ref, b_ref, o_ref):
        # x_ref: (TILE_N, d_p) bf16 streamed tile
        # w_ref: (L, d_p, 2*d_p) bf16, NN layout: [gate | proj] on the out axis
        # b_ref: (L, 1, 2*d_p)  f32,  gate biases first, then proj biases
        x = x_ref[...].astype(jnp.float32)      # carry residual stream in f32
        for i in range(n_layers):               # static unroll (L is small)
            # One fused MXU pass per layer, bf16 operands, f32 accumulation,
            # NN contraction (no in-kernel weight transpose).
            y = lax.dot_general(
                x.astype(jnp.bfloat16), w_ref[i],
                dimension_numbers=(((1,), (0,)), ((), ())),
                preferred_element_type=jnp.float32,
            ) + b_ref[i]
            g = jax.nn.sigmoid(y[:, :d_p])      # gate half   (EUP)
            h = jnp.maximum(y[:, d_p:], 0.0)    # relu(proj) half
            x = x + g * (h - x)                 # highway combine (fma form)
        o_ref[...] = x.astype(o_ref.dtype)
    return kernel


def prepare_highway_params(wx, bx, wg, bg):
    """One-time parameter conversion (hoisted out of the per-call hot path).

    wx, wg: (L, d, d) PyTorch-layout Linear weights (out, in); bx, bg: (L, d).
    Returns:
      w_cat: (L, d_p, 2*d_p) bf16 -- [gate | proj] weights, pre-transposed to
             (in, out) so the kernel contraction is NN (no XLU relayout).
      b_cat: (L, 1, 2*d_p) f32   -- [gate | proj] biases (padded cols stay 0).
      d:     original feature dim.
    """
    L, d, _ = wx.shape
    d_p = _round_up(d, 128)
    pad_io = ((0, 0), (0, d_p - d), (0, d_p - d))
    wg_t = jnp.pad(jnp.swapaxes(wg, 1, 2), pad_io)          # (L, d_p, d_p)
    wx_t = jnp.pad(jnp.swapaxes(wx, 1, 2), pad_io)          # (L, d_p, d_p)
    w_cat = jnp.concatenate([wg_t, wx_t], axis=2).astype(jnp.bfloat16)
    pad_o = ((0, 0), (0, d_p - d))
    b_cat = jnp.concatenate([jnp.pad(bg, pad_o), jnp.pad(bx, pad_o)], axis=1)
    b_cat = b_cat.reshape(L, 1, 2 * d_p).astype(jnp.float32)
    return w_cat, b_cat, d


def _resident_spec(block_shape):
    # Constant index_map -> the block never changes; single-buffer it to save
    # VMEM.  Fall back to the default spec on JAX versions without
    # pipeline_mode support.
    idx_map = lambda i: (0,) * len(block_shape)
    try:
        return pl.BlockSpec(block_shape, idx_map, pipeline_mode=pl.Buffered(1))
    except TypeError:
        return pl.BlockSpec(block_shape, idx_map)


def highway_pallas(x, w_cat, b_cat, d):
    """Highway forward.  x: (N, d) f32; params from prepare_highway_params."""
    N = x.shape[0]
    L, d_p, two_dp = w_cat.shape

    # ---- per-generation VMEM budget --------------------------------------
    try:
        phys_vmem = getattr(pltpu.get_tpu_info(), "vmem_capacity_bytes", 64 << 20)
    except Exception:  # not on TPU / API unavailable -> conservative default
        phys_vmem = 64 << 20
    vmem_budget = int(0.75 * phys_vmem)          # ~48 MiB on v7x, ~96 MiB v5e/v6e

    # Resident footprint (single-buffered weights/biases) + per-row live bytes:
    # double-buffered bf16 in tile, double-buffered f32 out tile, and the
    # in-kernel f32 intermediates (x, y=2*d_p, g, h) ~= 5*d_p f32 per row.
    w_bytes = w_cat.size * 2
    b_bytes = b_cat.size * 4
    per_row = (2 * 2 * d_p) + (2 * 4 * d_p) + (5 * 4 * d_p)
    row_budget = max(16, (vmem_budget - w_bytes - b_bytes - (2 << 20)) // per_row)
    row_budget = (row_budget // 16) * 16

    # Large tile to amortize grid-step overhead, but aim for >= 2 grid steps
    # when N allows (lights up both v7x TensorCores), bounded by VMEM.
    tile_n = min(512, _round_up(pl.cdiv(N, 2), 16), row_budget)
    tile_n = max(16, tile_n)
    n_p = _round_up(N, tile_n)

    x_in = x.astype(jnp.bfloat16)
    needs_pad = (n_p != N) or (d_p != d)
    if needs_pad:
        x_in = jnp.pad(x_in, ((0, n_p - N), (0, d_p - d)))

    out_p = pl.pallas_call(
        _highway_kernel(L, d_p),
        out_shape=jax.ShapeDtypeStruct((n_p, d_p), x.dtype),
        grid=(n_p // tile_n,),
        in_specs=[
            pl.BlockSpec((tile_n, d_p), lambda i: (i, 0)),   # streamed x tiles
            _resident_spec((L, d_p, 2 * d_p)),               # resident weights
            _resident_spec((L, 1, 2 * d_p)),                 # resident biases
        ],
        out_specs=pl.BlockSpec((tile_n, d_p), lambda i: (i, 0)),
        compiler_params=pltpu.CompilerParams(
            dimension_semantics=("parallel",),
            vmem_limit_bytes=int(vmem_budget),
        ),
    )(x_in, w_cat, b_cat)

    if needs_pad:
        out_p = out_p[:N, :d]
    return out_p


def highway_reference(x, wx, bx, wg, bg):
    """Pure-JAX f32 reference matching the PyTorch module exactly."""
    L = wx.shape[0]
    for i in range(L):
        g = jax.nn.sigmoid(x @ wg[i].T + bg[i])
        h = jnp.maximum(x @ wx[i].T + bx[i], 0.0)
        x = g * h + (1.0 - g) * x
    return x


if __name__ == "__main__":
    # Small shapes consistent with Highway(d, n_layers): x is (batch, d).
    N, d, n_layers = 8, 32, 2

    key = jax.random.PRNGKey(0)
    kx, kwx, kbx, kwg, kbg = jax.random.split(key, 5)

    # Deterministic init (PyTorch Linear default: U(-1/sqrt(d), 1/sqrt(d))).
    bound = 1.0 / (d ** 0.5)
    x = jax.random.normal(kx, (N, d), dtype=jnp.float32)
    wx = jax.random.uniform(kwx, (n_layers, d, d), minval=-bound, maxval=bound, dtype=jnp.float32)
    bx = jax.random.uniform(kbx, (n_layers, d), minval=-bound, maxval=bound, dtype=jnp.float32)
    wg = jax.random.uniform(kwg, (n_layers, d, d), minval=-bound, maxval=bound, dtype=jnp.float32)
    bg = jax.random.uniform(kbg, (n_layers, d), minval=-bound, maxval=bound, dtype=jnp.float32)

    # One-time parameter conversion (out of the per-call hot path).
    w_cat, b_cat, d_orig = prepare_highway_params(wx, bx, wg, bg)

    out = highway_pallas(x, w_cat, b_cat, d_orig)
    out = jax.block_until_ready(out)

    ref = highway_reference(x, wx, bx, wg, bg)
    assert out.shape == ref.shape, "shape mismatch vs reference"
    # bf16 MXU operands -> relaxed tolerance vs the f32 reference.
    assert jnp.allclose(out, ref, atol=3e-2, rtol=3e-2), "mismatch vs reference"
    print("KERNEL_OK")
</pallas_src>

<mosaic_0001>
module attributes {stable_mosaic.version = 11 : i64} {
  func.func @kernel(%arg0: i32, %arg1: memref<16x128xbf16, #tpu.memory_space<vmem>>, %arg2: memref<2x128x256xbf16, #tpu.memory_space<vmem>>, %arg3: memref<2x1x256xf32, #tpu.memory_space<vmem>>, %arg4: memref<16x128xf32, #tpu.memory_space<vmem>>) attributes {dimension_semantics = [#tpu.dimension_semantics<parallel>], iteration_bounds = array<i64: 1>, scalar_prefetch = 0 : i64, scratch_operands = 0 : i64, tpu.core_type = #tpu.core_type<tc>, window_params = [{transform_indices = @transform_0, window_bounds = array<i64: 16, 128>}, {pipeline_mode = #tpu.pipeline_mode<synchronous>, transform_indices = @transform_1, window_bounds = array<i64: 2, 128, 256>}, {pipeline_mode = #tpu.pipeline_mode<synchronous>, transform_indices = @transform_2, window_bounds = array<i64: 2, 1, 256>}, {transform_indices = @transform_3, window_bounds = array<i64: 16, 128>}]} {
    %c0 = arith.constant 0 : index
    %c0_0 = arith.constant 0 : index
    %0 = vector.load %arg1[%c0, %c0_0] : memref<16x128xbf16, #tpu.memory_space<vmem>>, vector<16x128xbf16>
    %1 = arith.extf %0 : vector<16x128xbf16> to vector<16x128xf32>
    %2 = arith.truncf %1 : vector<16x128xf32> to vector<16x128xbf16>
    %c0_1 = arith.constant 0 : index
    %c0_2 = arith.constant 0 : index
    %c0_3 = arith.constant 0 : index
    %3 = vector.load %arg2[%c0_1, %c0_2, %c0_3] : memref<2x128x256xbf16, #tpu.memory_space<vmem>>, vector<1x128x256xbf16>
    %4 = vector.shape_cast %3 : vector<1x128x256xbf16> to vector<128x256xbf16>
    %cst = arith.constant dense<0.000000e+00> : vector<16x256xf32>
    %5 = tpu.matmul %2, %4, %cst {dimension_numbers = #tpu.dot_dimension_numbers<[1], [0], [0], [1], [0, 0, 1, 1], [], []>} : vector<16x128xbf16>, vector<128x256xbf16>, vector<16x256xf32> -> vector<16x256xf32>
    %c0_4 = arith.constant 0 : index
    %c0_5 = arith.constant 0 : index
    %c0_6 = arith.constant 0 : index
    %6 = vector.load %arg3[%c0_4, %c0_5, %c0_6] : memref<2x1x256xf32, #tpu.memory_space<vmem>>, vector<1x1x256xf32>
    %7 = vector.shape_cast %6 : vector<1x1x256xf32> to vector<1x256xf32>
    %8 = vector.broadcast %7 : vector<1x256xf32> to vector<16x256xf32>
    %9 = arith.addf %5, %8 : vector<16x256xf32>
    %10 = vector.extract_strided_slice %9 {offsets = [0, 0], sizes = [16, 128], strides = [1, 1]} : vector<16x256xf32> to vector<16x128xf32>
    %11 = arith.negf %10 : vector<16x128xf32>
    %12 = math.exp %11 : vector<16x128xf32>
    %cst_7 = arith.constant 1.000000e+00 : f32
    %13 = vector.broadcast %cst_7 : f32 to vector<16x128xf32>
    %14 = arith.addf %13, %12 : vector<16x128xf32>
    %15 = arith.divf %13, %14 : vector<16x128xf32>
    %16 = vector.extract_strided_slice %9 {offsets = [0, 128], sizes = [16, 128], strides = [1, 1]} : vector<16x256xf32> to vector<16x128xf32>
    %cst_8 = arith.constant 0.000000e+00 : f32
    %17 = vector.broadcast %cst_8 : f32 to vector<16x128xf32>
    %18 = arith.maximumf %16, %17 : vector<16x128xf32>
    %19 = arith.subf %18, %1 : vector<16x128xf32>
    %20 = arith.mulf %15, %19 : vector<16x128xf32>
    %21 = arith.addf %1, %20 : vector<16x128xf32>
    %22 = arith.truncf %21 : vector<16x128xf32> to vector<16x128xbf16>
    %c1 = arith.constant 1 : index
    %c0_9 = arith.constant 0 : index
    %c0_10 = arith.constant 0 : index
    %23 = vector.load %arg2[%c1, %c0_9, %c0_10] : memref<2x128x256xbf16, #tpu.memory_space<vmem>>, vector<1x128x256xbf16>
    %24 = vector.shape_cast %23 : vector<1x128x256xbf16> to vector<128x256xbf16>
    %cst_11 = arith.constant dense<0.000000e+00> : vector<16x256xf32>
    %25 = tpu.matmul %22, %24, %cst_11 {dimension_numbers = #tpu.dot_dimension_numbers<[1], [0], [0], [1], [0, 0, 1, 1], [], []>} : vector<16x128xbf16>, vector<128x256xbf16>, vector<16x256xf32> -> vector<16x256xf32>
    %c1_12 = arith.constant 1 : index
    %c0_13 = arith.constant 0 : index
    %c0_14 = arith.constant 0 : index
    %26 = vector.load %arg3[%c1_12, %c0_13, %c0_14] : memref<2x1x256xf32, #tpu.memory_space<vmem>>, vector<1x1x256xf32>
    %27 = vector.shape_cast %26 : vector<1x1x256xf32> to vector<1x256xf32>
    %28 = vector.broadcast %27 : vector<1x256xf32> to vector<16x256xf32>
    %29 = arith.addf %25, %28 : vector<16x256xf32>
    %30 = vector.extract_strided_slice %29 {offsets = [0, 0], sizes = [16, 128], strides = [1, 1]} : vector<16x256xf32> to vector<16x128xf32>
    %31 = arith.negf %30 : vector<16x128xf32>
    %32 = math.exp %31 : vector<16x128xf32>
    %cst_15 = arith.constant 1.000000e+00 : f32
    %33 = vector.broadcast %cst_15 : f32 to vector<16x128xf32>
    %34 = arith.addf %33, %32 : vector<16x128xf32>
    %35 = arith.divf %33, %34 : vector<16x128xf32>
    %36 = vector.extract_strided_slice %29 {offsets = [0, 128], sizes = [16, 128], strides = [1, 1]} : vector<16x256xf32> to vector<16x128xf32>
    %cst_16 = arith.constant 0.000000e+00 : f32
    %37 = vector.broadcast %cst_16 : f32 to vector<16x128xf32>
    %38 = arith.maximumf %36, %37 : vector<16x128xf32>
    %39 = arith.subf %38, %21 : vector<16x128xf32>
    %40 = arith.mulf %35, %39 : vector<16x128xf32>
    %41 = arith.addf %21, %40 : vector<16x128xf32>
    %c0_17 = arith.constant 0 : index
    %c0_18 = arith.constant 0 : index
    %42 = vector.load %arg4[%c0_17, %c0_18] : memref<16x128xf32, #tpu.memory_space<vmem>>, vector<16x128xf32>
    tpu.vector_store %arg4[%c0_17, %c0_18], %41 {strides = array<i32>} : memref<16x128xf32, #tpu.memory_space<vmem>>, vector<16x128xf32>,
    return
  }
  func.func @transform_0(%arg0: i32) -> (i32, i32) {
    %c0_i32 = arith.constant 0 : i32
    %c0_i32_0 = arith.constant 0 : i32
    return %arg0, %c0_i32 : i32, i32
  }
  func.func @transform_1(%arg0: i32) -> (i32, i32, i32) {
    %c0_i32 = arith.constant 0 : i32
    %c0_i32_0 = arith.constant 0 : i32
    %c0_i32_1 = arith.constant 0 : i32
    %c0_i32_2 = arith.constant 0 : i32
    return %c0_i32, %c0_i32_0, %c0_i32_1 : i32, i32, i32
  }
  func.func @transform_2(%arg0: i32) -> (i32, i32, i32) {
    %c0_i32 = arith.constant 0 : i32
    %c0_i32_0 = arith.constant 0 : i32
    %c0_i32_1 = arith.constant 0 : i32
    %c0_i32_2 = arith.constant 0 : i32
    return %c0_i32, %c0_i32_0, %c0_i32_1 : i32, i32, i32
  }
  func.func @transform_3(%arg0: i32) -> (i32, i32) {
    %c0_i32 = arith.constant 0 : i32
    %c0_i32_0 = arith.constant 0 : i32
    return %arg0, %c0_i32 : i32, i32
  }
}

</mosaic_0001>

<bundles_post_ra>
// kernel: tpu_custom_call.1
= control target key start
LH: loop header
LB: loop body
LE: loop exit
PB: predicated region body
PF: predicated region fallthrough
CT: control target
= control target key end

     0   :  { %8 = vsyncpa [#allocation3], 0  ;;  %s684_s0 = inlined_call_operand.hbm [shape: bf16[16,128], index: 0, kind: input, shape index: {}]   ;;  %s685_s1 = inlined_call_operand.hbm [shape: bf16[2,128,256], index: 1, kind: input, shape index: {}]   ;;  %s686_s2 = inlined_call_operand.vmem [shape: f32[2,1,256], index: 2, kind: input, shape index: {}]   ;;  %s687_s3 = inlined_call_operand.hbm [shape: f32[16,128], index: 3, kind: output, shape index: {}]  }
   0x1   :  { %9 = vsyncpa [#allocation6], 0 }
   0x2   :  { %10 = vsyncpa [#allocation4], 0  ;;  %s603_s12 = smov [#allocation2]   ;;  %s531_s16 = scalar_lea.hbm %s684_s0, 128 }
   0x3   :  { %s16_s13 = sshll.u32 %s603_s12, 4  ;;  %p532_p0 = scmp.ne.s32.totalorder %s684_s0, %s531_s16  ;;  %s17_s13 = int_to_ptr.vmem [resolvable:$true] %s16_s13 }
   0x4   :  { %p535_p1 = scmp.lt.u32.totalorder %s531_s16, %s684_s0 }
   0x6   :  { %p537_p2 = pnand %p535_p1, %p532_p0 }
   0x8   :  { %540 = shalt.err (!%p537_p2)
}
   0x9   :  { %s541_s21 = scalar_lea.vmem %s17_s13, 128  ;;  %p546_p4 = scmp.lt.s32.totalorder %s17_s13, %s17_s13 }
   0xa   :  { %p542_p3 = scmp.ne.s32.totalorder %s17_s13, %s541_s21  ;;  %p547_p5 = scmp.lt.s32.totalorder %s541_s21, %s541_s21 }
   0xc   :  { %p548_p6 = por %p547_p5, %p546_p4 }
   0xe   :  { %p549_p7 = pnand %p548_p6, %p542_p3 }
  0x10   :  { %552 = shalt.err (!%p549_p7)
}
  0x11   :  { %s604_s22 = smov 64   ;;  %s605_s23 = smov 4  }
  0x12   :  { %22 = dma.hbm_to_vmem [thread:$0]  %s684_s0, 128, %s17_s13, [#allocation3], %s604_s22, %s604_s22, %s605_s23  }
  0x13   :  { %s606_s26 = smov [#allocation5]   ;;  %s553_s30 = scalar_lea.hbm %s685_s1, 4096 }
  0x14   :  { %s28_s27 = sshll.u32 %s606_s26, 4  ;;  %p554_p8 = scmp.ne.s32.totalorder %s685_s1, %s553_s30  ;;  %s29_s27 = int_to_ptr.vmem [resolvable:$true] %s28_s27 }
  0x15   :  { %p557_p9 = scmp.lt.u32.totalorder %s553_s30, %s685_s1 }
  0x17   :  { %p559_p10 = pnand %p557_p9, %p554_p8 }
  0x19   :  { %562 = shalt.err (!%p559_p10)
}
  0x1a   :  { %s563_s8 = scalar_lea.vmem %s29_s27, 4096  ;;  %p568_p12 = scmp.lt.s32.totalorder %s29_s27, %s29_s27 }
  0x1b   :  { %p564_p11 = scmp.ne.s32.totalorder %s29_s27, %s563_s8  ;;  %p569_p13 = scmp.lt.s32.totalorder %s563_s8, %s563_s8 }
  0x1d   :  { %p570_p0 = por %p569_p13, %p568_p12 }
  0x1f   :  { %p571_p1 = pnand %p570_p0, %p564_p11 }
  0x21   :  { %574 = shalt.err (!%p571_p1)
}
  0x22   :  { %s607_s0 = smov 128   ;;  %s608_s9 = smov 8  }
  0x23   :  { %34 = dma.hbm_to_vmem [thread:$0]  %s685_s1, 4096, %s29_s27, [#allocation6], %s607_s0, %s607_s0, %s608_s9  }
  0x24   :  { %597 = dma.done.wait [#allocation3], 128  }
  0x25   :  { %598 = vsyncadd [#allocation3], 4294967168 }
  0x26   :  { %599 = dma.done.wait [#allocation6], 4096  }
  0x27   :  { %600 = vsyncadd [#allocation6], 4294963200  ;;  %v609_v0 = vmov 0   ;;  %v465_v1 = vld [vmem:[#allocation5 + $0x4] ss:$8 sps:$4 sm:$0xff]   ;;  %v658_v17 = vld [vmem:[#allocation2] sm:$0xff]   ;;  %v66_v34 = vlaneseq }
  0x28   :  { %194 = vmatprep.mubr.bf16.mxu0 %v609_v0  ;;  %368 = vmatprep.mubr.bf16.mxu1 %v609_v0  ;;  %v467_v2 = vld [vmem:[#allocation5] ss:$8 sps:$4 sm:$0xff]   ;;  %v468_v3 = vld [vmem:[#allocation5 + $0x14] ss:$8 sps:$4 sm:$0xff]   ;;  %v470_v4 = vld [vmem:[#allocation5 + $0x10] ss:$8 sps:$4 sm:$0xff]   ;;  %v46_v55 = vunpack.c.l.bf16 %v658_v17  ;;  %v47_v57 = vunpack.c.h.bf16 %v658_v17 }
  0x29   :  { %162 = vmatprep.subr.bf16.mxu0 %v465_v1  ;;  %v471_v5 = vld [vmem:[#allocation5 + $0x24] ss:$8 sps:$4 sm:$0xff]   ;;  %v473_v6 = vld [vmem:[#allocation5 + $0x20] ss:$8 sps:$4 sm:$0xff]   ;;  %v474_v7 = vld [vmem:[#allocation5 + $0x34] ss:$8 sps:$4 sm:$0xff]  }
  0x2a   :  { %163 = vmatpush1.bf16.msra.mxu0 %v467_v2  ;;  %v476_v8 = vld [vmem:[#allocation5 + $0x30] ss:$8 sps:$4 sm:$0xff]   ;;  %v477_v9 = vld [vmem:[#allocation5 + $0x44] ss:$8 sps:$4 sm:$0xff]   ;;  %v479_v10 = vld [vmem:[#allocation5 + $0x40] ss:$8 sps:$4 sm:$0xff]  }
  0x2b   :  { %164 = vmatprep.subr.bf16.mxu0 %v468_v3  ;;  %v480_v11 = vld [vmem:[#allocation5 + $0x54] ss:$8 sps:$4 sm:$0xff]   ;;  %v482_v12 = vld [vmem:[#allocation5 + $0x50] ss:$8 sps:$4 sm:$0xff]   ;;  %v483_v13 = vld [vmem:[#allocation5 + $0x64] ss:$8 sps:$4 sm:$0xff]  }
  0x2c   :  { %v485_v14 = vld [vmem:[#allocation5 + $0x60] ss:$8 sps:$4 sm:$0xff]   ;;  %v486_v15 = vld [vmem:[#allocation5 + $0x74] ss:$8 sps:$4 sm:$0xff]   ;;  %v488_v16 = vld [vmem:[#allocation5 + $0x70] ss:$8 sps:$4 sm:$0xff]  }
  0x2d   :  { %v490_v18 = vld [vmem:[#allocation5 + $0x84] ss:$8 sps:$4 sm:$0xff]   ;;  %v492_v19 = vld [vmem:[#allocation5 + $0x80] ss:$8 sps:$4 sm:$0xff]   ;;  %v493_v20 = vld [vmem:[#allocation5 + $0x94] ss:$8 sps:$4 sm:$0xff]  }
  0x2e   :  { %165 = vmatpush1.bf16.msra.mxu0 %v470_v4  ;;  %336 = vmatprep.subr.bf16.mxu1 %v490_v18  ;;  %v495_v21 = vld [vmem:[#allocation5 + $0x90] ss:$8 sps:$4 sm:$0xff]   ;;  %v496_v22 = vld [vmem:[#allocation5 + $0xa4] ss:$8 sps:$4 sm:$0xff]   ;;  %v498_v23 = vld [vmem:[#allocation5 + $0xa0] ss:$8 sps:$4 sm:$0xff]  }
  0x2f   :  { %166 = vmatprep.subr.bf16.mxu0 %v471_v5  ;;  %337 = vmatpush1.bf16.msra.mxu1 %v492_v19  ;;  %v499_v24 = vld [vmem:[#allocation5 + $0xb4] ss:$8 sps:$4 sm:$0xff]   ;;  %v501_v25 = vld [vmem:[#allocation5 + $0xb0] ss:$8 sps:$4 sm:$0xff]   ;;  %v502_v26 = vld [vmem:[#allocation5 + $0xc4] ss:$8 sps:$4 sm:$0xff]  }
  0x30   :  { %338 = vmatprep.subr.bf16.mxu1 %v493_v20  ;;  %v504_v27 = vld [vmem:[#allocation5 + $0xc0] ss:$8 sps:$4 sm:$0xff]   ;;  %v505_v28 = vld [vmem:[#allocation5 + $0xd4] ss:$8 sps:$4 sm:$0xff]   ;;  %v507_v29 = vld [vmem:[#allocation5 + $0xd0] ss:$8 sps:$4 sm:$0xff]  }
  0x31   :  { %v508_v30 = vld [vmem:[#allocation5 + $0xe4] ss:$8 sps:$4 sm:$0xff]   ;;  %v510_v31 = vld [vmem:[#allocation5 + $0xe0] ss:$8 sps:$4 sm:$0xff]   ;;  %v511_v32 = vld [vmem:[#allocation5 + $0xf4] ss:$8 sps:$4 sm:$0xff]  }
  0x32   :  { %167 = vmatpush1.bf16.msra.mxu0 %v473_v6  ;;  %v513_v33 = vld [vmem:[#allocation5 + $0xf0] ss:$8 sps:$4 sm:$0xff]   ;;  %v67_v35 = vshrl.u32 %v66_v34, 7 }
  0x33   :  { %168 = vmatprep.subr.bf16.mxu0 %v474_v7  ;;  %339 = vmatpush1.bf16.msra.mxu1 %v495_v21  ;;  %v64_v37 = vld [vmem:[%s686_s2] sm:$0x3]  ;;  %v438_v4 = vld [vmem:[%s686_s2 + $0x2] sm:$0x3]  ;;  %s610_s2 = smov [#allocation7]  }
  0x34   :  { %340 = vmatprep.subr.bf16.mxu1 %v496_v22  ;;  %v68_v36 = vsub.s32 0, %v67_v35  ;;  %v72_v47 = vsub.s32 1, %v67_v35  ;;  %s406_s15 = sshll.u32 %s610_s2, 4  ;;  %s407_s15 = int_to_ptr.vmem [resolvable:$true] %s406_s15 }
  0x35   :  { %s575_s16 = scalar_lea.vmem %s407_s15, 256  ;;  %p580_p3 = scmp.lt.s32.totalorder %s407_s15, %s407_s15 }
  0x36   :  { %169 = vmatpush1.bf16.msra.mxu0 %v476_v8  ;;  %v69_v38 = vrot.slane %v64_v37, %v68_v36  ;;  %v73_v49 = vrot.slane %v64_v37, %v72_v47  ;;  %v249_v5 = vrot.slane %v438_v4, %v68_v36  ;;  %p576_p2 = scmp.ne.s32.totalorder %s407_s15, %s575_s16  ;;  %p581_p4 = scmp.lt.s32.totalorder %s575_s16, %s575_s16 }
  0x37   :  { %170 = vmatprep.subr.bf16.mxu0 %v477_v9  ;;  %341 = vmatpush1.bf16.msra.mxu1 %v498_v23 }
  0x38   :  { %342 = vmatprep.subr.bf16.mxu1 %v499_v24  ;;  %p582_p5 = por %p581_p4, %p580_p3 }
  0x3a   :  { %171 = vmatpush1.bf16.msra.mxu0 %v479_v10  ;;  %p583_p6 = pnand %p582_p5, %p576_p2 }
  0x3b   :  { %172 = vmatprep.subr.bf16.mxu0 %v480_v11  ;;  %343 = vmatpush1.bf16.msra.mxu1 %v501_v25 }
  0x3c   :  { %344 = vmatprep.subr.bf16.mxu1 %v502_v26 }
  0x3e   :  { %173 = vmatpush1.bf16.msra.mxu0 %v482_v12 }
  0x3f   :  { %174 = vmatprep.subr.bf16.mxu0 %v483_v13  ;;  %345 = vmatpush1.bf16.msra.mxu1 %v504_v27 }
  0x40   :  { %346 = vmatprep.subr.bf16.mxu1 %v505_v28 }
  0x42   :  { %175 = vmatpush1.bf16.msra.mxu0 %v485_v14 }
  0x43   :  { %176 = vmatprep.subr.bf16.mxu0 %v486_v15  ;;  %347 = vmatpush1.bf16.msra.mxu1 %v507_v29  ;;  %v253_v15 = vrot.slane %v438_v4, %v72_v47 }
  0x44   :  { %348 = vmatprep.subr.bf16.mxu1 %v508_v30 }
  0x46   :  { %177 = vmatpush1.bf16.msra.mxu0 %v488_v16 }
  0x47   :  { %349 = vmatpush1.bf16.msra.mxu1 %v510_v31 }
  0x48   :  { %350 = vmatprep.subr.bf16.mxu1 %v511_v32 }
  0x49   :  { %195 = vmatmul.mubr.bf16.vlgmr.msra.gmra.mrb[0].mxu0 %v658_v17 }
  0x4b   :  { %351 = vmatpush1.bf16.msra.mxu1 %v513_v33 }
 0x11c   :  { %v196_v39 = vpop.f32.mrb[0].mxu0 }
 0x11d   :  { %v197_v40 = vadd.f32 %v196_v39, %v69_v38  ;;  %v198_v41 = vpop.f32.mrb[1].mxu0 }
 0x11e   :  { %v200_v42 = vpop.f32.mrb[2].mxu0  ;;  %v199_v53 = vadd.f32 %v198_v41, %v73_v49 }
 0x11f   :  { %v436_v43 = vmul.f32 -1.442695, %v197_v40  ;;  %v201_v44 = vadd.f32 %v200_v42, %v69_v38  ;;  %v202_v45 = vpop.f32.mrb[3].mxu0 }
 0x120   :  { %v203_v54 = vadd.f32 %v202_v45, %v73_v49  ;;  %v217_v56 = vmax.f32 %v199_v53, 0.0 }
 0x121   :  { %515 = vpow2.f32 %v436_v43  ;;  %v437_v46 = vmul.f32 -1.442695, %v201_v44 }
 0x122   :  { %v218_v58 = vmax.f32 %v203_v54, 0.0  ;;  %v219_v59 = vsub.f32 %v217_v56, %v46_v55 }
 0x123   :  { %517 = vpow2.f32 %v437_v46 }
 0x124   :  { %v220_v62 = vsub.f32 %v218_v58, %v47_v57 }
 0x12b   :  { %v516_v48 = vpop.eup %515 }
 0x12c   :  { %v211_v50 = vadd.f32 1.0, %v516_v48 }
 0x12d   :  { %v518_v51 = vpop.eup %517 }
 0x12e   :  { %519 = vrcp.f32 %v211_v50  ;;  %v212_v52 = vadd.f32 1.0, %v518_v51 }
 0x130   :  { %521 = vrcp.f32 %v212_v52 }
 0x138   :  { %v520_v60 = vpop.eup %519 }
 0x139   :  { %v221_v61 = vmul.f32 %v520_v60, %v219_v59 }
 0x13a   :  { %v522_v63 = vpop.eup %521 }
 0x13b   :  { %v222_v0 = vmul.f32 %v522_v63, %v220_v62  ;;  %v223_v1 = vadd.f32 %v221_v61, %v46_v55 }
 0x13d   :  { %v224_v2 = vadd.f32 %v222_v0, %v47_v57 }
 0x13f   :  { %v225_v3 = vpack.c.bf16 %v224_v2, %v223_v1 }
 0x141   :  { %369 = vmatmul.mubr.bf16.vlgmr.msra.gmra.mrb[0].mxu1 %v225_v3 }
 0x214   :  { %v370_v6 = vpop.f32.mrb[0].mxu1 }
 0x215   :  { %v371_v7 = vadd.f32 %v370_v6, %v249_v5  ;;  %v372_v8 = vpop.f32.mrb[1].mxu1 }
 0x216   :  { %v374_v9 = vpop.f32.mrb[2].mxu1  ;;  %v373_v19 = vadd.f32 %v372_v8, %v253_v15 }
 0x217   :  { %v455_v10 = vmul.f32 -1.442695, %v371_v7  ;;  %v375_v11 = vadd.f32 %v374_v9, %v249_v5  ;;  %v376_v12 = vpop.f32.mrb[3].mxu1 }
 0x218   :  { %v377_v20 = vadd.f32 %v376_v12, %v253_v15  ;;  %v391_v21 = vmax.f32 %v373_v19, 0.0 }
 0x219   :  { %523 = vpow2.f32 %v455_v10  ;;  %v456_v13 = vmul.f32 -1.442695, %v375_v11 }
 0x21a   :  { %v392_v22 = vmax.f32 %v377_v20, 0.0  ;;  %v393_v23 = vsub.f32 %v391_v21, %v223_v1 }
 0x21b   :  { %525 = vpow2.f32 %v456_v13 }
 0x21c   :  { %v394_v26 = vsub.f32 %v392_v22, %v224_v2 }
 0x223   :  { %v524_v14 = vpop.eup %523 }
 0x224   :  { %v385_v16 = vadd.f32 1.0, %v524_v14 }
 0x225   :  { %v526_v17 = vpop.eup %525 }
 0x226   :  { %527 = vrcp.f32 %v385_v16  ;;  %v386_v18 = vadd.f32 1.0, %v526_v17 }
 0x228   :  { %529 = vrcp.f32 %v386_v18 }
 0x230   :  { %v528_v24 = vpop.eup %527 }
 0x231   :  { %v395_v25 = vmul.f32 %v528_v24, %v393_v23 }
 0x232   :  { %v530_v27 = vpop.eup %529 }
 0x233   :  { %v396_v28 = vmul.f32 %v530_v27, %v394_v26  ;;  %v397_v29 = vadd.f32 %v395_v25, %v223_v1 }
 0x235   :  { %v398_v30 = vadd.f32 %v396_v28, %v224_v2  ;;  %399 = vst [vmem:[#allocation7] sm:$0xff] %v397_v29 }
 0x237   :  { %400 = vst [vmem:[#allocation7 + $0x8] sm:$0xff] %v398_v30 }
 0x238   :  { %586 = shalt.err (!%p583_p6)
}
 0x239   :  { %s587_s19 = scalar_lea.hbm %s687_s3, 256 }
 0x23a   :  { %p588_p7 = scmp.ne.s32.totalorder %s687_s3, %s587_s19  ;;  %p591_p8 = scmp.lt.u32.totalorder %s587_s19, %s687_s3 }
 0x23c   :  { %p593_p9 = pnand %p591_p8, %p588_p7 }
 0x23e   :  { %596 = shalt.err (!%p593_p9)
}
 0x23f   :  { %412 = dma.vmem_to_hbm [thread:$0]  %s407_s15, 256, %s687_s3, [#allocation4], %s607_s0, %s607_s0, %s608_s9  }
 0x240   :  { %601 = dma.done.wait [#allocation4], 256  }
 0x241   :  { %602 = vsyncadd [#allocation4], 4294967040 }
 0x242   :  { %416 = vsyncpa [#allocation3], 1 }
 0x243   :  { %417 = vsyncpa [#allocation6], 1 }
 0x244   :  { %418 = vsyncpa [#allocation4], 1 }

</bundles_post_ra>
